<compile_context>
chip_gen: v5e
topology: v5e:2x2
jax: 0.10.0
libtpu: 0.0.40
codegen_flags: <defaults>
</compile_context>

<pallas_src>
import functools

import jax
import jax.numpy as jnp
from jax.experimental import pallas as pl
from jax.experimental.pallas import tpu as pltpu


_HI = jax.lax.Precision.HIGHEST


def _round_up(x, m):
    return (x + m - 1) // m * m


def _vmem_budget_bytes(n_src, n_edge, hidden):
    f32 = 4
    est = f32 * (2 * n_edge * n_src      # one-hot incidence matrices
                 + 2 * n_src * n_src     # weighted + count adjacency
                 + 8 * n_src * hidden    # x, xl, gcn, mean, h, temporaries
                 + 3 * hidden * hidden   # weight matrices
                 + 4 * n_edge)           # row / col / weight vectors
    return int(min(max(2 * est + (1 << 20), 4 << 20), 100 << 20))


def _make_layer_kernel(n_src, n_dst, n_edge, hidden):
    """Fused GlobalGNN layer: GCNConv (weighted, self-loops, symmetric norm,
    bias) followed by SAGEConv (mean aggregation, lin_l + bias, lin_r on the
    target slice, L2 normalize).  All dims are static (closure)."""

    def kernel(x_ref, row_ref, colT_ref, ew_ref,
               wg_ref, bg_ref, wl_ref, bl_ref, wr_ref, o_ref):
        f32 = jnp.float32
        dot = functools.partial(jnp.dot, preferred_element_type=f32, precision=_HI)

        x = x_ref[...]                     # (N, H) node features
        row = row_ref[...]                 # (E, 1) int32: source node per edge
        colT = colT_ref[...]               # (1, E) int32: target node per edge
        w = ew_ref[...]                    # (E, 1) f32 : edge weight

        # One-hot incidence matrices built on the VPU (no gathers/scatters).
        # Sentinel index == n_src (padding edges) gives an all-zero row/column,
        # so padded edges are exact no-ops.
        src_oh = (row == jax.lax.broadcasted_iota(
            jnp.int32, (n_edge, n_src), 1)).astype(f32)          # (E, N)
        dst_ohT = (colT == jax.lax.broadcasted_iota(
            jnp.int32, (n_src, n_edge), 0)).astype(f32)          # (N, E)

        # ---------------- GCNConv(x, edge_index, edge_weight) ----------------
        # Weighted adjacency W[i, j] = sum of edge weights over edges j -> i.
        w_adj = dot(dst_ohT, src_oh * w)                          # (N, N) on MXU
        deg = 1.0 + jnp.sum(w_adj, axis=1, keepdims=True)         # + self-loop(1.0)
        inv_deg = 1.0 / deg
        dis = jax.lax.rsqrt(deg)                                  # deg^-1/2, (N, 1)

        xl = dot(x, wg_ref[...])                                  # GCN linear (no bias)
        # D^-1/2 (A + I) D^-1/2 @ xl with the self-loop term done analytically
        # (xl / deg), avoiding materializing the normalized adjacency.
        gcn = dis * dot(w_adj, xl * dis) + xl * inv_deg + bg_ref[...]

        # ------------- SAGEConv((gcn, gcn[:n_dst]), edge_index) --------------
        cnt_adj = dot(dst_ohT, src_oh)                            # neighbour counts
        cnt = jnp.sum(dst_ohT, axis=1, keepdims=True)             # in-degree per dst
        nbr_mean = dot(cnt_adj, gcn) / jnp.maximum(cnt, 1.0)      # mean aggr (0 if none)

        # Rows >= n_dst are dead; drop them before the HxH matmuls only when the
        # slice stays sublane-aligned (otherwise the relayout costs more than the
        # dead FMAs at sampled-subgraph sizes).
        if n_dst % 8 == 0:
            gcn_t, mean_t = gcn[:n_dst, :], nbr_mean[:n_dst, :]
        else:
            gcn_t, mean_t = gcn, nbr_mean

        h = dot(mean_t, wl_ref[...]) + bl_ref[...] + dot(gcn_t, wr_ref[...])
        nrm = jnp.sqrt(jnp.sum(h * h, axis=-1, keepdims=True))
        h = h / jnp.maximum(nrm, 1e-12)                           # F.normalize(p=2)

        o_ref[...] = h[:n_dst, :]

    return kernel


def gnn_layer_pallas(x, edge_index, edge_weight, n_dst, gcn_params, sage_params):
    """One GlobalGNN layer as a single pallas_call (whole problem in VMEM)."""
    x = x.astype(jnp.float32)
    n_src, hidden = x.shape
    n_edge = edge_index.shape[1]

    # Pad the edge list to a multiple of 8 with sentinel node index n_src; its
    # one-hot rows/columns are identically zero, so padded edges are no-ops.
    e_pad = max(8, _round_up(n_edge, 8))
    pad = e_pad - n_edge
    row = edge_index[0].astype(jnp.int32)
    col = edge_index[1].astype(jnp.int32)
    ew = edge_weight.reshape(-1).astype(jnp.float32)
    if pad:
        row = jnp.concatenate([row, jnp.full((pad,), n_src, jnp.int32)])
        col = jnp.concatenate([col, jnp.full((pad,), n_src, jnp.int32)])
        ew = jnp.concatenate([ew, jnp.zeros((pad,), jnp.float32)])

    kernel = _make_layer_kernel(n_src, n_dst, e_pad, hidden)
    vmem_spec = pl.BlockSpec(memory_space=pltpu.MemorySpace.VMEM)

    return pl.pallas_call(
        kernel,
        out_shape=jax.ShapeDtypeStruct((n_dst, hidden), jnp.float32),
        in_specs=[vmem_spec] * 9,
        out_specs=vmem_spec,
        compiler_params=pltpu.CompilerParams(
            vmem_limit_bytes=_vmem_budget_bytes(n_src, e_pad, hidden)),
    )(x,
      row.reshape(e_pad, 1),
      col.reshape(1, e_pad),
      ew.reshape(e_pad, 1),
      gcn_params["w"], gcn_params["b"],
      sage_params["w_l"], sage_params["b_l"], sage_params["w_r"])


class GlobalGNNPallas:
    """JAX/Pallas port of the PyTorch GlobalGNN forward pass.

    One GCNConv (weights shared across layers, edge-weighted, self-loops,
    symmetric normalization, bias) followed per sampled layer by a
    SAGEConv(normalize=True) on the bipartite (all nodes -> target nodes)
    subgraph.  Mirrors the reference module, including its quirk of resetting
    x to x_all at the start of every layer.
    """

    def __init__(self, key, hidden_size=32, num_layers=2, dtype=jnp.float32):
        self.hidden_size = hidden_size
        self.num_layers = num_layers
        h = hidden_size
        keys = jax.random.split(key, 2 + 3 * num_layers)
        # Deterministic synthetic parameters (layouts chosen so the kernel does h @ W).
        self.gcn = {"w": 0.2 * jax.random.normal(keys[0], (h, h), dtype),
                    "b": 0.1 * jax.random.normal(keys[1], (1, h), dtype)}
        self.sage = []
        for i in range(num_layers):
            kw, kb, kr = keys[2 + 3 * i], keys[3 + 3 * i], keys[4 + 3 * i]
            self.sage.append({
                "w_l": 0.2 * jax.random.normal(kw, (h, h), dtype),
                "b_l": 0.1 * jax.random.normal(kb, (1, h), dtype),
                "w_r": 0.2 * jax.random.normal(kr, (h, h), dtype),
            })

    @staticmethod
    def _edge_weight(attr, e_id):
        # weight = attr[e_id].view(-1).float()  (trivial gather kept in the wrapper)
        return jnp.take(attr, e_id, axis=0).reshape(-1).astype(jnp.float32)

    def __call__(self, x, adjs, attr, asymmetric_mode=False, key=None):
        x_all = x if x.ndim >= 2 else x[None, :]
        xs = []
        if self.num_layers > 1:
            h = x_all
            for i, (edge_index, e_id, size) in enumerate(adjs):
                weight = self._edge_weight(attr, e_id)
                if asymmetric_mode:
                    key, sub = jax.random.split(key)
                    weight = weight * (1.0 + 0.08 * jax.random.normal(sub, weight.shape))
                h = x_all   # the reference module restarts from x_all each layer
                h = gnn_layer_pallas(h, edge_index, weight, size[1],
                                     self.gcn, self.sage[i])
                if i != self.num_layers - 1:
                    h = jax.nn.relu(h)
                    # TODO(synk): nn.Dropout is eval-mode identity here; training-time
                    # random masking is not implemented.
        else:
            edge_index, e_id, size = adjs.edge_index, adjs.e_id, adjs.size
            # TODO(synk): pre-GCN dropout is eval-mode identity here.
            weight = self._edge_weight(attr, e_id)
            if asymmetric_mode:
                key, sub = jax.random.split(key)
                weight = weight * (0.8 + 0.4 * jax.random.uniform(sub, weight.shape))
            h = gnn_layer_pallas(x_all, edge_index, weight, size[1],
                                 self.gcn, self.sage[-1])
        xs.append(h)
        return jnp.concatenate(xs, axis=0)


# ----------------------------- pure-JAX reference -----------------------------
def _ref_layer(x, edge_index, ew, n_dst, gcn_p, sage_p):
    n = x.shape[0]
    row, col = edge_index[0], edge_index[1]
    ew = ew.reshape(-1).astype(jnp.float32)
    deg = jnp.zeros((n,), jnp.float32).at[col].add(ew) + 1.0          # + self-loop
    dis = jax.lax.rsqrt(deg)
    xl = jnp.dot(x, gcn_p["w"], precision=_HI)
    msg = (dis[row] * ew * dis[col])[:, None] * xl[row]
    gcn = jnp.zeros_like(xl).at[col].add(msg) + xl / deg[:, None] + gcn_p["b"]
    cnt = jnp.zeros((n,), jnp.float32).at[col].add(jnp.ones_like(ew))
    nsum = jnp.zeros_like(gcn).at[col].add(gcn[row])
    nmean = nsum / jnp.maximum(cnt, 1.0)[:, None]
    h = (jnp.dot(nmean[:n_dst], sage_p["w_l"], precision=_HI) + sage_p["b_l"]
         + jnp.dot(gcn[:n_dst], sage_p["w_r"], precision=_HI))
    nrm = jnp.sqrt(jnp.sum(h * h, axis=-1, keepdims=True))
    return h / jnp.maximum(nrm, 1e-12)


def _ref_forward(model, x, adjs, attr):
    h = x
    for i, (edge_index, e_id, size) in enumerate(adjs):
        ew = jnp.take(attr, e_id, axis=0).reshape(-1)
        h = _ref_layer(x, edge_index, ew, size[1], model.gcn, model.sage[i])
        if i != model.num_layers - 1:
            h = jax.nn.relu(h)
    return h


if __name__ == "__main__":
    key = jax.random.PRNGKey(0)
    k_param, k_x, k_attr, k_a0, k_a1 = jax.random.split(key, 5)

    hidden = 32
    n_nodes = 16
    n_attr = 64
    model = GlobalGNNPallas(k_param, hidden_size=hidden, num_layers=2)

    x = jax.random.normal(k_x, (n_nodes, hidden), jnp.float32)
    attr = 0.5 + jax.random.uniform(k_attr, (n_attr,), jnp.float32)   # positive edge attrs

    def make_adj(k, n_src, n_dst, n_edge):
        k1, k2, k3 = jax.random.split(k, 3)
        col = jax.random.randint(k1, (n_edge,), 0, n_dst, dtype=jnp.int32)
        off = jax.random.randint(k2, (n_edge,), 1, n_src, dtype=jnp.int32)
        row = (col + off) % n_src        # row != col: no pre-existing self-loops
        e_id = jax.random.randint(k3, (n_edge,), 0, n_attr, dtype=jnp.int32)
        return (jnp.stack([row, col], axis=0), e_id, (n_src, n_dst))

    # Two sampled layers (num_layers = len(sample_size) = 2).
    adjs = [make_adj(k_a0, n_nodes, 12, 22),    # 22 edges -> exercises edge padding
            make_adj(k_a1, n_nodes, 8, 16)]

    fwd = jax.jit(lambda xx, aa: model(xx, adjs, aa))
    out = jax.block_until_ready(fwd(x, attr))
    assert out.shape == (8, hidden), out.shape

    ref = _ref_forward(model, x, adjs, attr)
    max_err = float(jnp.max(jnp.abs(out - ref)))
    assert jnp.allclose(out, ref, atol=1e-4, rtol=1e-4), max_err

    print("KERNEL_OK")
</pallas_src>

<mosaic_0001>
module attributes {stable_mosaic.version = 11 : i64} {
  func.func @kernel(%arg0: memref<16x32xf32, #tpu.memory_space<vmem>>, %arg1: memref<16x1xi32, #tpu.memory_space<vmem>>, %arg2: memref<1x16xi32, #tpu.memory_space<vmem>>, %arg3: memref<16x1xf32, #tpu.memory_space<vmem>>, %arg4: memref<32x32xf32, #tpu.memory_space<vmem>>, %arg5: memref<1x32xf32, #tpu.memory_space<vmem>>, %arg6: memref<32x32xf32, #tpu.memory_space<vmem>>, %arg7: memref<1x32xf32, #tpu.memory_space<vmem>>, %arg8: memref<32x32xf32, #tpu.memory_space<vmem>>, %arg9: memref<8x32xf32, #tpu.memory_space<vmem>>) attributes {dimension_semantics = [], scalar_prefetch = 0 : i64, scratch_operands = 0 : i64, tpu.core_type = #tpu.core_type<tc>} {
    %c0 = arith.constant 0 : index
    %c0_0 = arith.constant 0 : index
    %0 = vector.load %arg0[%c0, %c0_0] : memref<16x32xf32, #tpu.memory_space<vmem>>, vector<16x32xf32>
    %c0_1 = arith.constant 0 : index
    %c0_2 = arith.constant 0 : index
    %1 = vector.load %arg1[%c0_1, %c0_2] : memref<16x1xi32, #tpu.memory_space<vmem>>, vector<16x1xi32>
    %c0_3 = arith.constant 0 : index
    %c0_4 = arith.constant 0 : index
    %2 = vector.load %arg2[%c0_3, %c0_4] : memref<1x16xi32, #tpu.memory_space<vmem>>, vector<1x16xi32>
    %c0_5 = arith.constant 0 : index
    %c0_6 = arith.constant 0 : index
    %3 = vector.load %arg3[%c0_5, %c0_6] : memref<16x1xf32, #tpu.memory_space<vmem>>, vector<16x1xf32>
    %4 = tpu.iota {dimensions = array<i32: 1>} : vector<16x16xi32>
    %5 = vector.broadcast %1 : vector<16x1xi32> to vector<16x16xi32>
    %6 = arith.cmpi eq, %5, %4 : vector<16x16xi32>
    %7 = arith.extui %6 : vector<16x16xi1> to vector<16x16xi32>
    %8 = arith.sitofp %7 : vector<16x16xi32> to vector<16x16xf32>
    %9 = tpu.iota {dimensions = array<i32: 0>} : vector<16x16xi32>
    %10 = vector.broadcast %2 : vector<1x16xi32> to vector<16x16xi32>
    %11 = arith.cmpi eq, %10, %9 : vector<16x16xi32>
    %12 = arith.extui %11 : vector<16x16xi1> to vector<16x16xi32>
    %13 = arith.sitofp %12 : vector<16x16xi32> to vector<16x16xf32>
    %14 = vector.broadcast %3 : vector<16x1xf32> to vector<16x16xf32>
    %15 = arith.mulf %8, %14 : vector<16x16xf32>
    %cst = arith.constant dense<0.000000e+00> : vector<16x16xf32>
    %16 = tpu.matmul %13, %15, %cst {dimension_numbers = #tpu.dot_dimension_numbers<[1], [0], [0], [1], [0, 0, 1, 1], [], []>, precision = #tpu.contract_precision<fp32>} : vector<16x16xf32>, vector<16x16xf32>, vector<16x16xf32> -> vector<16x16xf32>
    %cst_7 = arith.constant dense<0.000000e+00> : vector<16xf32>
    %17 = vector.multi_reduction <add>, %16, %cst_7 [1] : vector<16x16xf32> to vector<16xf32>
    %18 = vector.shape_cast %17 : vector<16xf32> to vector<16x1xf32>
    %cst_8 = arith.constant 1.000000e+00 : f32
    %19 = vector.broadcast %cst_8 : f32 to vector<16x1xf32>
    %20 = arith.addf %19, %18 : vector<16x1xf32>
    %cst_9 = arith.constant 1.000000e+00 : f32
    %21 = vector.broadcast %cst_9 : f32 to vector<16x1xf32>
    %22 = arith.divf %21, %20 : vector<16x1xf32>
    %23 = math.rsqrt %20 : vector<16x1xf32>
    %c0_10 = arith.constant 0 : index
    %c0_11 = arith.constant 0 : index
    %24 = vector.load %arg4[%c0_10, %c0_11] : memref<32x32xf32, #tpu.memory_space<vmem>>, vector<32x32xf32>
    %cst_12 = arith.constant dense<0.000000e+00> : vector<16x32xf32>
    %25 = tpu.matmul %0, %24, %cst_12 {dimension_numbers = #tpu.dot_dimension_numbers<[1], [0], [0], [1], [0, 0, 1, 1], [], []>, precision = #tpu.contract_precision<fp32>} : vector<16x32xf32>, vector<32x32xf32>, vector<16x32xf32> -> vector<16x32xf32>
    %26 = vector.broadcast %23 : vector<16x1xf32> to vector<16x32xf32>
    %27 = arith.mulf %25, %26 : vector<16x32xf32>
    %cst_13 = arith.constant dense<0.000000e+00> : vector<16x32xf32>
    %28 = tpu.matmul %16, %27, %cst_13 {dimension_numbers = #tpu.dot_dimension_numbers<[1], [0], [0], [1], [0, 0, 1, 1], [], []>, precision = #tpu.contract_precision<fp32>} : vector<16x16xf32>, vector<16x32xf32>, vector<16x32xf32> -> vector<16x32xf32>
    %29 = vector.broadcast %23 : vector<16x1xf32> to vector<16x32xf32>
    %30 = arith.mulf %29, %28 : vector<16x32xf32>
    %31 = vector.broadcast %22 : vector<16x1xf32> to vector<16x32xf32>
    %32 = arith.mulf %25, %31 : vector<16x32xf32>
    %33 = arith.addf %30, %32 : vector<16x32xf32>
    %c0_14 = arith.constant 0 : index
    %c0_15 = arith.constant 0 : index
    %34 = vector.load %arg5[%c0_14, %c0_15] : memref<1x32xf32, #tpu.memory_space<vmem>>, vector<1x32xf32>
    %35 = vector.broadcast %34 : vector<1x32xf32> to vector<16x32xf32>
    %36 = arith.addf %33, %35 : vector<16x32xf32>
    %cst_16 = arith.constant dense<0.000000e+00> : vector<16x16xf32>
    %37 = tpu.matmul %13, %8, %cst_16 {dimension_numbers = #tpu.dot_dimension_numbers<[1], [0], [0], [1], [0, 0, 1, 1], [], []>, precision = #tpu.contract_precision<fp32>} : vector<16x16xf32>, vector<16x16xf32>, vector<16x16xf32> -> vector<16x16xf32>
    %cst_17 = arith.constant dense<0.000000e+00> : vector<16xf32>
    %38 = vector.multi_reduction <add>, %13, %cst_17 [1] : vector<16x16xf32> to vector<16xf32>
    %39 = vector.shape_cast %38 : vector<16xf32> to vector<16x1xf32>
    %cst_18 = arith.constant dense<0.000000e+00> : vector<16x32xf32>
    %40 = tpu.matmul %37, %36, %cst_18 {dimension_numbers = #tpu.dot_dimension_numbers<[1], [0], [0], [1], [0, 0, 1, 1], [], []>, precision = #tpu.contract_precision<fp32>} : vector<16x16xf32>, vector<16x32xf32>, vector<16x32xf32> -> vector<16x32xf32>
    %cst_19 = arith.constant 1.000000e+00 : f32
    %41 = vector.broadcast %cst_19 : f32 to vector<16x1xf32>
    %42 = arith.maximumf %39, %41 : vector<16x1xf32>
    %43 = vector.broadcast %42 : vector<16x1xf32> to vector<16x32xf32>
    %44 = arith.divf %40, %43 : vector<16x32xf32>
    %45 = vector.extract_strided_slice %36 {offsets = [0, 0], sizes = [8, 32], strides = [1, 1]} : vector<16x32xf32> to vector<8x32xf32>
    %46 = vector.extract_strided_slice %44 {offsets = [0, 0], sizes = [8, 32], strides = [1, 1]} : vector<16x32xf32> to vector<8x32xf32>
    %c0_20 = arith.constant 0 : index
    %c0_21 = arith.constant 0 : index
    %47 = vector.load %arg6[%c0_20, %c0_21] : memref<32x32xf32, #tpu.memory_space<vmem>>, vector<32x32xf32>
    %cst_22 = arith.constant dense<0.000000e+00> : vector<8x32xf32>
    %48 = tpu.matmul %46, %47, %cst_22 {dimension_numbers = #tpu.dot_dimension_numbers<[1], [0], [0], [1], [0, 0, 1, 1], [], []>, precision = #tpu.contract_precision<fp32>} : vector<8x32xf32>, vector<32x32xf32>, vector<8x32xf32> -> vector<8x32xf32>
    %c0_23 = arith.constant 0 : index
    %c0_24 = arith.constant 0 : index
    %49 = vector.load %arg7[%c0_23, %c0_24] : memref<1x32xf32, #tpu.memory_space<vmem>>, vector<1x32xf32>
    %50 = vector.broadcast %49 : vector<1x32xf32> to vector<8x32xf32>
    %51 = arith.addf %48, %50 : vector<8x32xf32>
    %c0_25 = arith.constant 0 : index
    %c0_26 = arith.constant 0 : index
    %52 = vector.load %arg8[%c0_25, %c0_26] : memref<32x32xf32, #tpu.memory_space<vmem>>, vector<32x32xf32>
    %cst_27 = arith.constant dense<0.000000e+00> : vector<8x32xf32>
    %53 = tpu.matmul %45, %52, %cst_27 {dimension_numbers = #tpu.dot_dimension_numbers<[1], [0], [0], [1], [0, 0, 1, 1], [], []>, precision = #tpu.contract_precision<fp32>} : vector<8x32xf32>, vector<32x32xf32>, vector<8x32xf32> -> vector<8x32xf32>
    %54 = arith.addf %51, %53 : vector<8x32xf32>
    %55 = arith.mulf %54, %54 : vector<8x32xf32>
    %cst_28 = arith.constant dense<0.000000e+00> : vector<8xf32>
    %56 = vector.multi_reduction <add>, %55, %cst_28 [1] : vector<8x32xf32> to vector<8xf32>
    %57 = vector.shape_cast %56 : vector<8xf32> to vector<8x1xf32>
    %58 = math.sqrt %57 : vector<8x1xf32>
    %cst_29 = arith.constant 9.99999996E-13 : f32
    %59 = vector.broadcast %cst_29 : f32 to vector<8x1xf32>
    %60 = arith.maximumf %58, %59 : vector<8x1xf32>
    %61 = vector.broadcast %60 : vector<8x1xf32> to vector<8x32xf32>
    %62 = arith.divf %54, %61 : vector<8x32xf32>
    %c0_30 = arith.constant 0 : index
    %c0_31 = arith.constant 0 : index
    %63 = vector.load %arg9[%c0_30, %c0_31] : memref<8x32xf32, #tpu.memory_space<vmem>>, vector<8x32xf32>
    tpu.vector_store %arg9[%c0_30, %c0_31], %62 {strides = array<i32>} : memref<8x32xf32, #tpu.memory_space<vmem>>, vector<8x32xf32>,
    return
  }
}

</mosaic_0001>

<bundles_post_ra>
// kernel: _lambda_.1
= control target key start
LH: loop header
LB: loop body
LE: loop exit
PB: predicated region body
PF: predicated region fallthrough
CT: control target
= control target key end

     0   :  { %v1676_v2 = vmov 0   ;;  %s2050_s0 = inlined_call_operand.vmem [shape: f32[16,32], index: 0, kind: input, shape index: {}]   ;;  %s2051_s1 = inlined_call_operand.vmem [shape: s32[16,1], index: 1, kind: input, shape index: {}]   ;;  %s2052_s2 = inlined_call_operand.vmem [shape: s32[1,16], index: 2, kind: input, shape index: {}]   ;;  %s2053_s3 = inlined_call_operand.vmem [shape: f32[16,1], index: 3, kind: input, shape index: {}]   ;;  %s2054_s4 = inlined_call_operand.vmem [shape: f32[32,32], index: 4, kind: input, shape index: {}]   ;;  %s2055_s5 = inlined_call_operand.vmem [shape: f32[1,32], index: 5, kind: input, shape index: {}]   ;;  %s2056_s6 = inlined_call_operand.vmem [shape: f32[32,32], index: 6, kind: input, shape index: {}]   ;;  %s2057_s7 = inlined_call_operand.vmem [shape: f32[1,32], index: 7, kind: input, shape index: {}]   ;;  %s2058_s8 = inlined_call_operand.vmem [shape: f32[32,32], index: 8, kind: input, shape index: {}]   ;;  %s2059_s9 = inlined_call_operand.hbm [shape: f32[8,32], index: 9, kind: output, shape index: {}]  }
   0x1   :  { %v39_v0 = vld [vmem:[%s2053_s3 + $0x8] sm:$0xff]  ;;  %1632 = vset.pattern.permute.xlu1 %v1676_v2  ;;  %1631 = vset.pattern.permute.xlu0 %v1676_v2 }
   0x2   :  { %v36_v1 = vld [vmem:[%s2051_s1 + $0x8] sm:$0xff]  ;;  %71 = vperm.xlu1 %1632, %v39_v0  }
   0x3   :  { %46 = vperm.xlu0 %1631, %v36_v1  }
   0x4   :  { %14 = vsyncpa [#allocation3], 0  ;;  %v38_v3 = vld [vmem:[%s2053_s3] sm:$0xff]  ;;  %v40_v5 = vlaneseq  ;;  %v1677_v8 = vmov 0.0   ;;  %vm76_vm1 = vcmask 130048   ;;  %v334_v37 = vld [vmem:[%s2054_s4 + $0x18] sm:$0xff] }
   0x5   :  { %v35_v4 = vld [vmem:[%s2051_s1] sm:$0xff]  ;;  %v333_v38 = vld [vmem:[%s2054_s4 + $0x10] sm:$0xff]  ;;  %v1798_v40 = vand.u32 4294901760, %v334_v37  ;;  %v332_v42 = vld [vmem:[%s2054_s4 + $0x8] sm:$0xff]  ;;  %vm335_vm5 = vcmask 261120   ;;  %s1596_s22 = sshll.u32 %s2059_s9, 4  ;;  %s1597_s22 = int_to_ptr.hbm [resolvable:$true] %s1596_s22 }
   0x6   :  { %v55_v6 = vshrl.u32 %v40_v5, 7  ;;  %v1633_v7 = vld [vmem:[%s2052_s2] ss:$0 sm:$0xff]  ;;  %v1747_v11 = vand.u32 127, %v40_v5  ;;  %v1800_v41 = vand.u32 4294901760, %v333_v38  ;;  %v1813_v49 = vand.u32 4294901760, %v332_v42 }
   0x7   :  { %v392_v44 = vsub.f32 %v334_v37, %v1798_v40  ;;  %v33_v55 = vld [vmem:[%s2050_s0] sm:$0xff] }
   0x8   :  { %vm58_vm0 = vcmp.eq.s32.totalorder %v1633_v7, %v55_v6  ;;  %v56_v10 = vadd.s32 8, %v55_v6  ;;  %v398_v45 = vsub.f32 %v333_v38, %v1800_v41  ;;  %v337_v56 = vsel %vm335_vm5, %v33_v55, 0  ;;  %v331_v57 = vld [vmem:[%s2054_s4] sm:$0xff] }
   0x9   :  { %v1745_v9 = vsel %vm58_vm0, 1.0, %v1677_v8  ;;  %v393_v48 = vand.u32 4294901760, %v392_v44  ;;  %v362_v58 = vand.u32 4294901760, %v337_v56  ;;  %v360_v59 = vand.u32 4294901760, %v331_v57 }
   0xa   :  { %66 = vperm.xlu1 %1632, %v38_v3   ;;  %v78_v12 = vsel %vm76_vm1, %v1745_v9, 0  ;;  %vm59_vm2 = vcmp.eq.s32.totalorder %v1633_v7, %v56_v10  ;;  %v399_v50 = vand.u32 4294901760, %v398_v45  ;;  %v404_v60 = vsub.f32 %v332_v42, %v1813_v49 }
   0xb   :  { %43 = vperm.xlu0 %1631, %v35_v4   ;;  %v1753_v15 = vsub.f32 %v78_v12, %v78_v12  ;;  %v1757_v16 = vsel %vm59_vm2, 1.0, %v1677_v8  ;;  %v394_v51 = vsub.f32 %v392_v44, %v393_v48  ;;  %v363_v61 = vsub.f32 %v337_v56, %v362_v58  ;;  %v34_v4 = vld [vmem:[%s2050_s0 + $0x8] sm:$0xff] }
   0xc   :  { %v81_v21 = vsel %vm76_vm1, %v1757_v16, 0  ;;  %v400_v52 = vsub.f32 %v398_v45, %v399_v50  ;;  %v405_v62 = vand.u32 4294901760, %v404_v60  ;;  %v410_v63 = vsub.f32 %v331_v57, %v360_v59 }
   0xd   :  { %v1766_v19 = vand.u32 4294901760, %v1753_v15  ;;  %v1774_v25 = vsub.f32 %v81_v21, %v81_v21  ;;  %v395_v53 = vand.u32 4294901760, %v394_v51  ;;  %v364_v0 = vand.u32 4294901760, %v363_v61 }
   0xe   :  { %v401_v54 = vand.u32 4294901760, %v400_v52  ;;  %v406_v1 = vsub.f32 %v404_v60, %v405_v62  ;;  %v411_v2 = vand.u32 4294901760, %v410_v63  ;;  %v340_v7 = vsel %vm335_vm5, %v34_v4, 0 }
   0xf   :  { %v104_v24 = vsub.f32 %v1753_v15, %v1766_v19  ;;  %v1787_v32 = vand.u32 4294901760, %v1774_v25  ;;  %v365_v3 = vsub.f32 %v363_v61, %v364_v0  ;;  %v370_v10 = vand.u32 4294901760, %v340_v7 }
  0x10   :  { %v407_v5 = vand.u32 4294901760, %v406_v1  ;;  %v412_v6 = vsub.f32 %v410_v63, %v411_v2 }
  0x11   :  { %v1784_v31 = vand.u32 4294901760, %v104_v24  ;;  %v112_v36 = vsub.f32 %v1774_v25, %v1787_v32 }
  0x12   :  { %v413_v12 = vand.u32 4294901760, %v412_v6 }
  0x13   :  { %v1810_v46 = vand.u32 4294901760, %v112_v36 }
  0x74   :  { %v72_v13 = vpop.permute.xlu1 %71 }
  0x75   :  { %v1751_v14 = vpop.permute.xlu0 %46 }
  0x76   :  { %vm49_vm3 = vcmp.eq.s32.totalorder %v1751_v14, %v1747_v11 }
  0x77   :  { %v1762_v17 = vsel %vm49_vm3, 1.0, %v1677_v8 }
  0x78   :  { %v75_v18 = vmul.f32 %v1762_v17, %v72_v13  ;;  %v371_v13 = vsub.f32 %v340_v7, %v370_v10 }
  0x7a   :  { %v97_v20 = vand.u32 4294901760, %v75_v18 }
  0x7c   :  { %98 = vmatpush.msra.mxu0 %v97_v20  ;;  %199 = vmatpush.msra.mxu3 %v97_v20  ;;  %v133_v22 = vsub.f32 %v75_v18, %v97_v20  ;;  %v67_v27 = vpop.permute.xlu1 %66  ;;  %v372_v18 = vand.u32 4294901760, %v371_v13 }
  0x7d   :  { %v1770_v23 = vpop.permute.xlu0 %43 }
  0x7e   :  { %vm48_vm4 = vcmp.eq.s32.totalorder %v1770_v23, %v1747_v11  ;;  %169 = vmatpush.msra.mxu2 %v133_v22  ;;  %v134_v26 = vand.u32 4294901760, %v133_v22 }
  0x7f   :  { %v1781_v28 = vsel %vm48_vm4, 1.0, %v1677_v8  ;;  %v366_v8 = vand.u32 4294901760, %v365_v3 }
  0x80   :  { %v74_v29 = vmul.f32 %v1781_v28, %v67_v27  ;;  %v135_v30 = vsub.f32 %v133_v22, %v134_v26 }
  0x82   :  { %v99_v33 = vand.u32 4294901760, %v74_v29  ;;  %v136_v34 = vand.u32 4294901760, %v135_v30 }
  0x84   :  { %100 = vmatpush.msra.mxu0 %v99_v33  ;;  %137 = vmatpush.msra.mxu1 %v136_v34  ;;  %v139_v35 = vsub.f32 %v74_v29, %v99_v33 }
  0x85   :  { %201 = vmatpush.msra.mxu3 %v99_v33  ;;  %106 = vmatmul.f32.vlgmr.msra.gmra.mxu0 %v1784_v31 }
  0x86   :  { %232 = vmatpush.msrb.mxu0 %v134_v26  ;;  %172 = vmatpush.msra.mxu2 %v139_v35  ;;  %v140_v39 = vand.u32 4294901760, %v139_v35 }
  0x87   :  { %175 = vmatmul.f32.vlgmr.msra.gmra.mxu2 %v1753_v15  ;;  %205 = vmatmul.f32.vlgmr.msra.gmra.mxu3 %v1766_v19 }
  0x88   :  { %236 = vmatpush.msrb.mxu0 %v140_v39  ;;  %v141_v43 = vsub.f32 %v139_v35, %v140_v39  ;;  %355 = vmatpush.msrb.mxu2 %v1798_v40 }
  0x89   :  { %396 = vmatpush.msrb.mxu3 %v395_v53 }
  0x8a   :  { %v142_v47 = vand.u32 4294901760, %v141_v43  ;;  %357 = vmatpush.msrb.mxu2 %v1800_v41  ;;  %438 = vmatpush.msra.mxu0 %v392_v44 }
  0x8b   :  { %402 = vmatpush.msrb.mxu3 %v401_v54 }
  0x8c   :  { %143 = vmatpush.msra.mxu1 %v142_v47  ;;  %359 = vmatpush.msrb.mxu2 %v1813_v49 }
  0x8d   :  { %114 = vmatmul.f32.gmra.mxu0 %v1810_v46  ;;  %1609 = vmatmul.msk.f32.vlgmr.msra.gmra.mxu1 %vm76_vm1, %v1745_v9 }
  0x8e   :  { %261 = vmatpush.msrb.mxu1 %v97_v20  ;;  %441 = vmatpush.msra.mxu0 %v398_v45  ;;  %v373_v20 = vsub.f32 %v371_v13, %v372_v18 }
  0x8f   :  { %180 = vmatmul.f32.gmra.mxu2 %v1774_v25  ;;  %211 = vmatmul.f32.gmra.mxu3 %v1787_v32 }
  0x90   :  { %263 = vmatpush.msrb.mxu1 %v99_v33  ;;  %361 = vmatpush.msrb.mxu2 %v360_v59  ;;  %v374_v21 = vand.u32 4294901760, %v373_v20 }
  0x91   :  { %444 = vmatpush.msra.mxu0 %v404_v60  ;;  %408 = vmatpush.msrb.mxu3 %v407_v5 }
  0x92   :  { %472 = vmatpush.msra.mxu1 %v1798_v40  ;;  %507 = vmatpush.msra.mxu2 %v393_v48 }
  0x93   :  { %447 = vmatpush.msra.mxu0 %v410_v63  ;;  %414 = vmatpush.msrb.mxu3 %v413_v12 }
  0x94   :  { %474 = vmatpush.msra.mxu1 %v1800_v41  ;;  %511 = vmatpush.msra.mxu2 %v399_v50 }
  0x95   :  { %1610 = vmatmul.msk.f32.gmra.mxu1 %vm76_vm1, %v1757_v16  ;;  %1611 = vmatmul.msk.f32.vlgmr.msrb.gmra.mxu0 %vm76_vm1, %v1745_v9 }
  0x96   :  { %476 = vmatpush.msra.mxu1 %v1813_v49  ;;  %515 = vmatpush.msra.mxu2 %v405_v62 }
  0x97   :  { %367 = vmatmul.f32.vlgmr.msrb.gmra.mxu2 %v366_v8  ;;  %416 = vmatmul.f32.vlgmr.msrb.gmra.mxu3 %v362_v58 }
  0x98   :  { %478 = vmatpush.msra.mxu1 %v360_v59  ;;  %519 = vmatpush.msra.mxu2 %v411_v2 }
  0x99   :  { %542 = vmatpush.msra.mxu3 %v1798_v40 }
  0x9b   :  { %544 = vmatpush.msra.mxu3 %v1800_v41 }
  0x9d   :  { %1612 = vmatmul.msk.f32.gmra.mxu0 %vm76_vm1, %v1757_v16  ;;  %1613 = vmatmul.msk.f32.vlgmr.msrb.gmra.mxu1 %vm76_vm1, %v1745_v9 }
  0x9e   :  { %546 = vmatpush.msra.mxu3 %v1813_v49 }
  0x9f   :  { %375 = vmatmul.f32.gmra.mxu2 %v374_v21  ;;  %420 = vmatmul.f32.gmra.mxu3 %v370_v10 }
  0xa0   :  { %548 = vmatpush.msra.mxu3 %v360_v59 }
  0xa5   :  { %1614 = vmatmul.msk.f32.gmra.mxu1 %vm76_vm1, %v1757_v16  ;;  %450 = vmatmul.f32.vlgmr.msra.gmra.mxu0 %v363_v61 }
  0xa7   :  { %521 = vmatmul.f32.vlgmr.msra.gmra.mxu2 %v362_v58  ;;  %550 = vmatmul.f32.vlgmr.msra.gmra.mxu3 %v362_v58 }
  0xad   :  { %482 = vmatmul.f32.vlgmr.msra.gmra.mxu1 %v364_v0  ;;  %455 = vmatmul.f32.gmra.mxu0 %v371_v13 }
  0xaf   :  { %525 = vmatmul.f32.gmra.mxu2 %v370_v10  ;;  %554 = vmatmul.f32.gmra.mxu3 %v370_v10 }
  0xb5   :  { %488 = vmatmul.f32.gmra.mxu1 %v372_v18 }
 0x102   :  { %v107_v22 = vpop.f32.mrf.mxu0 }
 0x10a   :  { %v115_v24 = vpop.f32.mrf.mxu0  ;;  %v146_v26 = vpop.f32.mrf.mxu1 }
 0x10b   :  { %v176_v27 = vpop.f32.mrf.mxu2  ;;  %v206_v29 = vpop.f32.mrf.mxu3  ;;  %v147_v39 = vadd.f32 %v146_v26, %v107_v22 }
 0x10d   :  { %v177_v42 = vadd.f32 %v176_v27, %v147_v39 }
 0x10f   :  { %v207_v47 = vadd.f32 %v206_v29, %v177_v42 }
 0x112   :  { %v150_v30 = vpop.f32.mrf.mxu1  ;;  %v239_v33 = vpop.f32.mrf.mxu0 }
 0x113   :  { %v151_v34 = vadd.f32 %v150_v30, %v115_v24  ;;  %v181_v35 = vpop.f32.mrf.mxu2  ;;  %v212_v38 = vpop.f32.mrf.mxu3  ;;  %v240_v49 = vadd.f32 %v239_v33, %v207_v47 }
 0x115   :  { %v182_v37 = vadd.f32 %v181_v35, %v151_v34 }
 0x117   :  { %v213_v41 = vadd.f32 %v212_v38, %v182_v37 }
 0x11a   :  { %v266_v36 = vpop.f32.mrf.mxu1  ;;  %v243_v40 = vpop.f32.mrf.mxu0 }
 0x11b   :  { %v244_v43 = vadd.f32 %v243_v40, %v213_v41  ;;  %v267_v50 = vadd.f32 %v266_v36, %v240_v49  ;;  %v368_v52 = vpop.f32.mrf.mxu2  ;;  %v417_v53 = vpop.f32.mrf.mxu3 }
 0x11c   :  { %v418_v2 = vadd.f32 %v417_v53, %v368_v52 }
 0x11d   :  { %v273_v51 = vsel %vm76_vm1, %v267_v50, 0.0  ;;  %v561_v22 = vsel %vm76_vm1, %v267_v50, 0 }
 0x11e   :  { %v1866_v34 = vand.u32 4294901760, %v561_v22 }
 0x120   :  { %v585_v50 = vsub.f32 %v561_v22, %v1866_v34 }
 0x122   :  { %v270_v44 = vpop.f32.mrf.mxu1  ;;  %v451_v55 = vpop.f32.mrf.mxu0 }
 0x123   :  { %v1849_v45 = vadd.f32 %v270_v44, %v244_v43  ;;  %v376_v54 = vpop.f32.mrf.mxu2  ;;  %v421_v56 = vpop.f32.mrf.mxu3  ;;  %v452_v18 = vadd.f32 %v451_v55, %v418_v2  ;;  %v586_v2 = vand.u32 4294901760, %v585_v50 }
 0x124   :  { %v422_v59 = vadd.f32 %v421_v56, %v376_v54 }
 0x125   :  { %v276_v48 = vsel %vm76_vm1, %v1849_v45, 0.0  ;;  %v564_v53 = vsel %vm76_vm1, %v1849_v45, 0 }
 0x126   :  { %277 = vadd.xlane.f32.xlu2 %v276_v48 }
 0x12a   :  { %v483_v57 = vpop.f32.mrf.mxu1  ;;  %v456_v62 = vpop.f32.mrf.mxu0 }
 0x12b   :  { %v522_v58 = vpop.f32.mrf.mxu2  ;;  %v1854_v63 = vpop.f32.mrf.mxu3  ;;  %v457_v0 = vadd.f32 %v456_v62, %v422_v59  ;;  %v484_v35 = vadd.f32 %v483_v57, %v452_v18 }
 0x12d   :  { %v523_v57 = vadd.f32 %v522_v58, %v484_v35 }
 0x12e   :  { %274 = vadd.xlane.f32.xlu2 %v273_v51 }
 0x132   :  { %v489_v1 = vpop.f32.mrf.mxu1 }
 0x133   :  { %v490_v3 = vadd.f32 %v489_v1, %v457_v0  ;;  %v526_v6 = vpop.f32.mrf.mxu2  ;;  %v555_v29 = vpop.f32.mrf.mxu3  ;;  %v824_v1 = vsub.f32 %v1781_v28, %v1781_v28 }
 0x135   :  { %v527_v20 = vadd.f32 %v526_v6, %v490_v3  ;;  %v552_v6 = vadd.f32 %v1854_v63, %v523_v57  ;;  %v587_v63 = vsub.f32 %v585_v50, %v586_v2 }
 0x137   :  { %v556_v37 = vadd.f32 %v555_v29, %v527_v20 }
 0x199   :  { %v278_v60 = vpop.xlane.xlu2 %277 }
 0x19a   :  { %v280_v61 = vadd.f32 1.0, %v278_v60 }
 0x19c   :  { %1636 = vrcp.f32 %v280_v61  ;;  %vm301_vm6 = vweird.f32 %v280_v61  ;;  %v305_v24 = vand.u32 2147483647, %v280_v61  ;;  %v307_v26 = vand.u32 2147483648, %v280_v61 }
 0x19d   :  { %1638 = vrsqrt.f32 %v280_v61 }
 0x19e   :  { %vm306_vm9 = vcmp.eq.f32.partialorder %v305_v24, 8.507059e+37  ;;  %v308_v39 = vor.u32 1.1754944e-38, %v307_v26 }
 0x1a1   :  { %v275_v4 = vpop.xlane.xlu2 %274 }
 0x1a2   :  { %v1637_v5 = vpop.eup %1636  ;;  %v1856_v7 = vadd.f32 1.0, %v275_v4  ;;  %v1894_v4 = vand.u32 4294901760, %v564_v53 }
 0x1a3   :  { %v1639_v8 = vpop.eup %1638  ;;  %v297_v10 = vmul.f32 %v1637_v5, %v280_v61  ;;  %vm302_vm7 = vweird.f32 %v1637_v5 }
 0x1a4   :  { %1640 = vrcp.f32 %v1856_v7  ;;  %vm1860_vm8 = vmor %vm301_vm6, %vm302_vm7  ;;  %v322_v13 = vmul.f32 %v1639_v8, %v280_v61  ;;  %vm328_vm10 = vweird.f32 %v1639_v8  ;;  %vm286_vm11 = vweird.f32 %v1856_v7 }
 0x1a5   :  { %1642 = vrsqrt.f32 %v1856_v7  ;;  %v298_v21 = vsub.f32 1.0, %v297_v10  ;;  %vm329_vm14 = vmor %vm301_vm6, %vm328_vm10  ;;  %v292_v56 = vand.u32 2147483648, %v1856_v7  ;;  %v290_v62 = vand.u32 2147483647, %v1856_v7 }
 0x1a6   :  { %v323_v27 = vmul.f32 %v1639_v8, %v322_v13  ;;  %v818_v61 = vsub.f32 %v1762_v17, %v1762_v17  ;;  %v593_v22 = vsub.f32 %v564_v53, %v1894_v4 }
 0x1a7   :  { %v299_v30 = vmul.f32 %v1637_v5, %v298_v21  ;;  %v293_v58 = vor.u32 1.1754944e-38, %v292_v56  ;;  %vm291_vm0 = vcmp.eq.f32.partialorder %v290_v62, 8.507059e+37  ;;  %v825_v21 = vand.u32 4294901760, %v824_v1  ;;  %v1634_v62 = vld [vmem:[%s2055_s5] ss:$0 sm:$0xff] }
 0x1a8   :  { %v324_v33 = vmul.f32 0.5, %v323_v27  ;;  %v819_v12 = vand.u32 4294901760, %v818_v61 }
 0x1a9   :  { %v300_v36 = vadd.f32 %v1637_v5, %v299_v30  ;;  %v826_v35 = vsub.f32 %v824_v1, %v825_v21 }
 0x1aa   :  { %v1641_v38 = vpop.eup %1640  ;;  %v325_v40 = vsub.f32 1.5, %v324_v33  ;;  %v820_v27 = vsub.f32 %v818_v61, %v819_v12  ;;  %v588_v33 = vand.u32 4294901760, %v587_v63 }
 0x1ab   :  { %v1643_v41 = vpop.eup %1642  ;;  %v304_v42 = vsel %vm1860_vm8, %v1637_v5, %v300_v36  ;;  %v282_v43 = vmul.f32 %v1641_v38, %v1856_v7  ;;  %vm287_vm12 = vweird.f32 %v1641_v38  ;;  %v594_v36 = vand.u32 4294901760, %v593_v22 }
 0x1ac   :  { %v309_v44 = vsel %vm306_vm9, %v308_v39, %v304_v42  ;;  %v326_v47 = vmul.f32 %v1639_v8, %v325_v40  ;;  %v312_v48 = vmul.f32 %v1643_v41, %v1856_v7  ;;  %vm1875_vm13 = vmor %vm286_vm11, %vm287_vm12  ;;  %vm318_vm15 = vweird.f32 %v1643_v41 }
 0x1ad   :  { %v1881_v51 = vmul.f32 %v556_v37, %v309_v44  ;;  %v283_v52 = vsub.f32 1.0, %v282_v43  ;;  %vm319_vm2 = vmor %vm286_vm11, %vm318_vm15  ;;  %v827_v39 = vand.u32 4294901760, %v826_v35  ;;  %v1678_v42 = vmov 1.0  }
 0x1ae   :  { %v1885_v54 = vsel %vm329_vm14, %v1639_v8, %v326_v47  ;;  %v313_v55 = vmul.f32 %v1643_v41, %v312_v48 }
 0x1af   :  { %v559_v59 = vmul.f32 %v556_v37, %v1885_v54  ;;  %v284_v60 = vmul.f32 %v1641_v38, %v283_v52  ;;  %v821_v37 = vand.u32 4294901760, %v820_v27 }
 0x1b0   :  { %v314_v0 = vmul.f32 0.5, %v313_v55 }
 0x1b1   :  { %v580_v45 = vand.u32 4294901760, %v559_v59  ;;  %v285_v3 = vadd.f32 %v1641_v38, %v284_v60 }
 0x1b2   :  { %v315_v5 = vsub.f32 1.5, %v314_v0 }
 0x1b3   :  { %v616_v8 = vsub.f32 %v559_v59, %v580_v45  ;;  %581 = vmatpush.msrb.mxu0 %v580_v45  ;;  %682 = vmatpush.msrb.mxu3 %v580_v45  ;;  %v289_v17 = vsel %vm1875_vm13, %v1641_v38, %v285_v3 }
 0x1b4   :  { %v316_v10 = vmul.f32 %v1643_v41, %v315_v5  ;;  %v294_v28 = vsel %vm291_vm0, %v293_v58, %v289_v17 }
 0x1b5   :  { %v617_v13 = vand.u32 4294901760, %v616_v8  ;;  %652 = vmatpush.msrb.mxu2 %v616_v8  ;;  %v1901_v18 = vmul.f32 %v552_v6, %v294_v28 }
 0x1b6   :  { %v1903_v20 = vsel %vm319_vm2, %v1643_v41, %v316_v10  ;;  %v595_v41 = vsub.f32 %v593_v22, %v594_v36 }
 0x1b7   :  { %v558_v24 = vmul.f32 %v552_v6, %v1903_v20  ;;  %v618_v26 = vsub.f32 %v616_v8, %v617_v13 }
 0x1b8   :  { %v596_v44 = vand.u32 4294901760, %v595_v41 }
 0x1b9   :  { %v582_v29 = vand.u32 4294901760, %v558_v24  ;;  %v619_v30 = vand.u32 4294901760, %v618_v26 }
 0x1bb   :  { %583 = vmatpush.msrb.mxu0 %v582_v29  ;;  %620 = vmatpush.msrb.mxu1 %v619_v30  ;;  %v622_v7 = vsub.f32 %v558_v24, %v582_v29 }
 0x1bc   :  { %684 = vmatpush.msrb.mxu3 %v582_v29  ;;  %589 = vmatmul.f32.vlgmr.msrb.gmra.mxu0 %v588_v33 }
 0x1bd   :  { %688 = vmatmul.f32.vlgmr.msrb.gmra.mxu3 %v586_v2  ;;  %715 = vmatpush.msra.mxu0 %v617_v13  ;;  %v623_v38 = vand.u32 4294901760, %v622_v7 }
 0x1be   :  { %822 = vmatpush.msra.mxu3 %v821_v37  ;;  %655 = vmatpush.msrb.mxu2 %v622_v7 }
 0x1bf   :  { %658 = vmatmul.f32.vlgmr.msrb.gmra.mxu2 %v585_v50  ;;  %719 = vmatpush.msra.mxu0 %v623_v38  ;;  %v624_v40 = vsub.f32 %v622_v7, %v623_v38 }
 0x1c0   :  { %1615 = vmatpush.msk.msra.mxu2 %vm49_vm3, %v1678_v42  ;;  %828 = vmatpush.msra.mxu3 %v827_v39 }
 0x1c1   :  { %854 = vmatpush.msrb.mxu0 %v818_v61  ;;  %v625_v43 = vand.u32 4294901760, %v624_v40 }
 0x1c2   :  { %1623 = vmatpush.msk.msrb.mxu3 %vm49_vm3, %v1678_v42  ;;  %1616 = vmatpush.msk.msra.mxu2 %vm48_vm4, %v1678_v42 }
 0x1c3   :  { %857 = vmatpush.msrb.mxu0 %v824_v1  ;;  %626 = vmatpush.msrb.mxu1 %v625_v43 }
 0x1c4   :  { %917 = vmatpush.msrb.mxu2 %v819_v12  ;;  %1624 = vmatpush.msk.msrb.mxu3 %vm48_vm4, %v1678_v42 }
 0x1c5   :  { %597 = vmatmul.f32.gmra.mxu0 %v596_v44  ;;  %628 = vmatmul.f32.vlgmr.msrb.gmra.mxu1 %v1866_v34 }
 0x1c6   :  { %921 = vmatpush.msrb.mxu2 %v825_v21  ;;  %694 = vmatmul.f32.gmra.mxu3 %v594_v36 }
 0x1c7   :  { %744 = vmatpush.msra.mxu1 %v580_v45  ;;  %663 = vmatmul.f32.gmra.mxu2 %v593_v22 }
 0x1c9   :  { %746 = vmatpush.msra.mxu1 %v582_v29 }
 0x1cb   :  { %1619 = vmatpush.msk.msrb.mxu1 %vm49_vm3, %v1678_v42 }
 0x1cd   :  { %1620 = vmatpush.msk.msrb.mxu1 %vm48_vm4, %v1678_v42  ;;  %721 = vmatmul.f32.vlgmr.msra.gmra.mxu0 %v1866_v34 }
 0x1ce   :  { %632 = vmatmul.f32.gmra.mxu1 %v1894_v4  ;;  %1617 = vmatmul.msk.f32.vlgmr.msra.gmra.mxu3 %vm76_vm1, %v1745_v9 }
 0x1cf   :  { %791 = vmatmul.f32.vlgmr.msra.gmra.mxu2 %v1784_v31 }
 0x1d5   :  { %725 = vmatmul.f32.gmra.mxu0 %v1894_v4 }
 0x1d6   :  { %748 = vmatmul.f32.vlgmr.msra.gmra.mxu1 %v1866_v34  ;;  %1618 = vmatmul.msk.f32.gmra.mxu3 %vm76_vm1, %v1757_v16 }
 0x1d7   :  { %799 = vmatmul.f32.gmra.mxu2 %v1810_v46 }
 0x1dd   :  { %860 = vmatmul.f32.vlgmr.msrb.gmra.mxu0 %v1753_v15 }
 0x1de   :  { %752 = vmatmul.f32.gmra.mxu1 %v1894_v4  ;;  %1625 = vmatmul.msk.f32.vlgmr.msrb.gmra.mxu3 %vm76_vm1, %v1745_v9 }
 0x1df   :  { %1621 = vmatmul.msk.f32.vlgmr.msrb.gmra.mxu2 %vm76_vm1, %v1745_v9 }
 0x1e5   :  { %865 = vmatmul.f32.gmra.mxu0 %v1774_v25 }
 0x1e6   :  { %890 = vmatmul.f32.vlgmr.msrb.gmra.mxu1 %v1766_v19  ;;  %1626 = vmatmul.msk.f32.gmra.mxu3 %vm76_vm1, %v1757_v16 }
 0x1e7   :  { %1622 = vmatmul.msk.f32.gmra.mxu2 %vm76_vm1, %v1757_v16 }
 0x1ee   :  { %896 = vmatmul.f32.gmra.mxu1 %v1787_v32  ;;  %v958_v32 = vsel %vm76_vm1, %v1745_v9, 0.0 }
 0x1ef   :  { %959 = vadd.xlane.f32.xlu0 %v958_v32 }
 0x239   :  { %v590_v11 = vpop.f32.mrf.mxu0 }
 0x240   :  { %v689_v14 = vpop.f32.mrf.mxu3 }
 0x242   :  { %v598_v15 = vpop.f32.mrf.mxu0  ;;  %v659_v23 = vpop.f32.mrf.mxu2 }
 0x243   :  { %v629_v31 = vpop.f32.mrf.mxu1 }
 0x244   :  { %v630_v46 = vadd.f32 %v629_v31, %v590_v11 }
 0x246   :  { %v660_v49 = vadd.f32 %v659_v23, %v630_v46 }
 0x248   :  { %v690_v50 = vadd.f32 %v689_v14, %v660_v49  ;;  %v1170_v49 = vld [vmem:[%s2056_s6 + $0x18] sm:$0xff] }
 0x249   :  { %v695_v34 = vpop.f32.mrf.mxu3 }
 0x24a   :  { %v664_v47 = vpop.f32.mrf.mxu2  ;;  %v722_v48 = vpop.f32.mrf.mxu0 }
 0x24b   :  { %v633_v25 = vpop.f32.mrf.mxu1  ;;  %v723_v53 = vadd.f32 %v722_v48, %v690_v50  ;;  %v1169_v50 = vld [vmem:[%s2056_s6 + $0x10] sm:$0xff] }
 0x24c   :  { %v634_v19 = vadd.f32 %v633_v25, %v598_v15 }
 0x24e   :  { %v665_v57 = vadd.f32 %v664_v47, %v634_v19  ;;  %v1190_v19 = vand.u32 4294901760, %v1170_v49 }
 0x250   :  { %v696_v61 = vadd.f32 %v695_v34, %v665_v57  ;;  %v1167_v57 = vld [vmem:[%s2056_s6] sm:$0xff] }
 0x251   :  { %v831_v52 = vpop.f32.mrf.mxu3 }
 0x252   :  { %v792_v55 = vpop.f32.mrf.mxu2  ;;  %v726_v56 = vpop.f32.mrf.mxu0 }
 0x253   :  { %v749_v16 = vpop.f32.mrf.mxu1  ;;  %v727_v1 = vadd.f32 %v726_v56, %v696_v61  ;;  %v832_v8 = vadd.f32 %v831_v52, %v792_v55  ;;  %v1220_v52 = vsub.f32 %v1170_v49, %v1190_v19  ;;  %v1168_v55 = vld [vmem:[%s2056_s6 + $0x8] sm:$0xff]  ;;  %v1196_v61 = vand.u32 4294901760, %v1167_v57 }
 0x254   :  { %v750_v59 = vadd.f32 %v749_v16, %v723_v53  ;;  %v1192_v53 = vand.u32 4294901760, %v1169_v50  ;;  %v1194_v32 = vand.u32 4294901760, %v1168_v55 }
 0x255   :  { %v1221_v56 = vand.u32 4294901760, %v1220_v52 }
 0x256   :  { %v756_v60 = vmul.f32 %v750_v59, %v1903_v20  ;;  %v1226_v16 = vsub.f32 %v1169_v50, %v1192_v53 }
 0x257   :  { %v1222_v59 = vsub.f32 %v1220_v52, %v1221_v56 }
 0x258   :  { %v760_v0 = vadd.f32 %v1901_v18, %v756_v60  ;;  %v1227_v60 = vand.u32 4294901760, %v1226_v16 }
 0x259   :  { %v835_v4 = vpop.f32.mrf.mxu3 }
 0x25a   :  { %v1956_v2 = vadd.f32 %v1634_v62, %v760_v0  ;;  %v800_v45 = vpop.f32.mrf.mxu2  ;;  %v861_v9 = vpop.f32.mrf.mxu0 }
 0x25b   :  { %v753_v3 = vpop.f32.mrf.mxu1  ;;  %v862_v12 = vadd.f32 %v861_v9, %v832_v8  ;;  %v836_v27 = vadd.f32 %v835_v4, %v800_v45  ;;  %v1228_v45 = vsub.f32 %v1226_v16, %v1227_v60  ;;  %v1238_v4 = vsub.f32 %v1167_v57, %v1196_v61 }
 0x25c   :  { %v754_v5 = vadd.f32 %v753_v3, %v727_v1  ;;  %v983_v6 = vand.u32 4294901760, %v1956_v2  ;;  %v1223_v1 = vand.u32 4294901760, %v1222_v59 }
 0x25d   :  { %v1229_v9 = vand.u32 4294901760, %v1228_v45 }
 0x25e   :  { %v757_v58 = vmul.f32 %v754_v5, %v1885_v54  ;;  %v1022_v13 = vsub.f32 %v1956_v2, %v983_v6 }
 0x260   :  { %v761_v17 = vadd.f32 %v1881_v51, %v757_v58  ;;  %v1023_v26 = vand.u32 4294901760, %v1022_v13 }
 0x261   :  { %v951_v20 = vpop.f32.mrf.mxu3 }
 0x262   :  { %v767_v10 = vadd.f32 %v1634_v62, %v761_v17  ;;  %v924_v28 = vpop.f32.mrf.mxu2  ;;  %v866_v54 = vpop.f32.mrf.mxu0  ;;  %v1024_v7 = vsub.f32 %v1022_v13, %v1023_v26  ;;  %v1232_v62 = vsub.f32 %v1168_v55, %v1194_v32 }
 0x263   :  { %v891_v18 = vpop.f32.mrf.mxu1  ;;  %v867_v30 = vadd.f32 %v866_v54, %v836_v27  ;;  %v960_v0 = vpop.xlane.xlu0 %959 }
 0x264   :  { %v892_v63 = vadd.f32 %v891_v18, %v862_v12  ;;  %v981_v21 = vand.u32 4294901760, %v767_v10  ;;  %v1025_v44 = vand.u32 4294901760, %v1024_v7  ;;  %v1233_v3 = vand.u32 4294901760, %v1232_v62 }
 0x265   :  { %v1976_v5 = vmax.f32 %v960_v0, 1.0 }
 0x266   :  { %v925_v22 = vadd.f32 %v924_v28, %v892_v63  ;;  %982 = vmatpush.msra.mxu0 %v981_v21  ;;  %1080 = vmatpush.msra.mxu3 %v981_v21  ;;  %v1016_v24 = vsub.f32 %v767_v10, %v981_v21  ;;  %v1234_v58 = vsub.f32 %v1232_v62, %v1233_v3  ;;  %v1366_v10 = vld [vmem:[%s2058_s8 + $0x18] sm:$0xff]  ;;  %v1364_v63 = vld [vmem:[%s2058_s8 + $0x8] sm:$0xff] }
 0x267   :  { %1644 = vrcp.f32 %v1976_v5  ;;  %v1982_v28 = vand.u32 4294901760, %v1366_v10 }
 0x268   :  { %v952_v29 = vadd.f32 %v951_v20, %v925_v22  ;;  %984 = vmatpush.msra.mxu0 %v983_v6  ;;  %1051 = vmatpush.msra.mxu2 %v1016_v24  ;;  %v1017_v51 = vand.u32 4294901760, %v1016_v24  ;;  %v1235_v8 = vand.u32 4294901760, %v1234_v58 }
 0x269   :  { %1082 = vmatpush.msra.mxu3 %v983_v6  ;;  %v955_v42 = vpop.f32.mrf.mxu3  ;;  %v1988_v18 = vsub.f32 %v1366_v10, %v1982_v28 }
 0x26a   :  { %v962_v33 = vsel %vm76_vm1, %v952_v29, 0  ;;  %1054 = vmatpush.msra.mxu2 %v1022_v13  ;;  %1112 = vmatpush.msrb.mxu0 %v1017_v51  ;;  %v1018_v35 = vsub.f32 %v1016_v24, %v1017_v51  ;;  %v928_v38 = vpop.f32.mrf.mxu2  ;;  %v1365_v13 = vld [vmem:[%s2058_s8 + $0x10] sm:$0xff] }
 0x26b   :  { %v985_v36 = vand.u32 4294901760, %v962_v33  ;;  %v897_v37 = vpop.f32.mrf.mxu1  ;;  %1224 = vmatpush.msrb.mxu3 %v1223_v1  ;;  %v1991_v20 = vand.u32 4294901760, %v1365_v13 }
 0x26c   :  { %v898_v39 = vadd.f32 %v897_v37, %v867_v30  ;;  %1116 = vmatpush.msrb.mxu0 %v1023_v26  ;;  %v1019_v40 = vand.u32 4294901760, %v1018_v35  ;;  %1191 = vmatpush.msrb.mxu2 %v1190_v19  ;;  %v2004_v26 = vand.u32 4294901760, %v1364_v63 }
 0x26d   :  { %v986_v41 = vsub.f32 %v962_v33, %v985_v36  ;;  %1230 = vmatpush.msrb.mxu3 %v1229_v9  ;;  %v2001_v24 = vsub.f32 %v1365_v13, %v1991_v20  ;;  %v1645_v27 = vpop.eup %1644  ;;  %v1635_v13 = vld [vmem:[%s2057_s7] ss:$0 sm:$0xff]  ;;  %s1679_s7 = smov [#allocation2]  }
 0x26e   :  { %v929_v43 = vadd.f32 %v928_v38, %v898_v39  ;;  %1020 = vmatpush.msra.mxu1 %v1019_v40  ;;  %1193 = vmatpush.msrb.mxu2 %v1192_v53  ;;  %v2010_v29 = vsub.f32 %v1364_v63, %v2004_v26  ;;  %v1153_v35 = vmul.f32 %v1645_v27, %v1976_v5  ;;  %vm1158_vm3 = vweird.f32 %v1645_v27  ;;  %s1594_s19 = sshll.u32 %s1679_s7, 4  ;;  %s1595_s19 = int_to_ptr.vmem [resolvable:$true] %s1594_s19 }
 0x26f   :  { %1057 = vmatmul.f32.vlgmr.msra.gmra.mxu2 %v986_v41  ;;  %v987_v11 = vand.u32 4294901760, %v986_v41  ;;  %1236 = vmatpush.msrb.mxu3 %v1235_v8 }
 0x270   :  { %v956_v14 = vadd.f32 %v955_v42, %v929_v43  ;;  %1026 = vmatpush.msra.mxu1 %v1025_v44  ;;  %1195 = vmatpush.msrb.mxu2 %v1194_v32  ;;  %v1154_v37 = vsub.f32 1.0, %v1153_v35  ;;  %v1425_v50 = vand.u32 4294901760, %v2010_v29 }
 0x271   :  { %1028 = vmatmul.f32.vlgmr.msra.gmra.mxu1 %v985_v36  ;;  %1086 = vmatmul.f32.vlgmr.msra.gmra.mxu3 %v987_v11  ;;  %v988_v15 = vsub.f32 %v986_v41, %v987_v11  ;;  %v1163_v11 = vand.u32 2147483648, %v1976_v5 }
 0x272   :  { %v965_v23 = vsel %vm76_vm1, %v956_v14, 0  ;;  %1140 = vmatpush.msrb.mxu1 %v981_v21  ;;  %1197 = vmatpush.msrb.mxu2 %v1196_v61  ;;  %v1363_v21 = vld [vmem:[%s2058_s8] sm:$0xff]  ;;  %v1155_v41 = vmul.f32 %v1645_v27, %v1154_v37  ;;  %vm1157_vm1 = vweird.f32 %v1976_v5 }
 0x273   :  { %v993_v31 = vand.u32 4294901760, %v965_v23  ;;  %v989_v46 = vand.u32 4294901760, %v988_v15  ;;  %v2006_v54 = vand.u32 4294901760, %v1363_v21  ;;  %v1161_v15 = vand.u32 2147483647, %v1976_v5  ;;  %vm1159_vm4 = vmor %vm1157_vm1, %vm1158_vm3 }
 0x274   :  { %1142 = vmatpush.msrb.mxu1 %v983_v6  ;;  %v1239_v6 = vand.u32 4294901760, %v1238_v4  ;;  %1262 = vmatpush.msra.mxu2 %v1220_v52  ;;  %v1156_v14 = vadd.f32 %v1645_v27, %v1155_v41 }
 0x275   :  { %v994_v34 = vsub.f32 %v965_v23, %v993_v31  ;;  %990 = vmatmul.f32.vlgmr.msra.gmra.mxu0 %v989_v46  ;;  %v2014_v51 = vsub.f32 %v1363_v21, %v2006_v54  ;;  %vm1162_vm6 = vcmp.eq.f32.partialorder %v1161_v15, 8.507059e+37 }
 0x276   :  { %1351 = vmatpush.msra.mxu1 %v1190_v19  ;;  %1320 = vmatpush.msra.mxu0 %v1221_v56  ;;  %v1240_v17 = vsub.f32 %v1238_v4, %v1239_v6 }
 0x277   :  { %1062 = vmatmul.f32.gmra.mxu2 %v994_v34  ;;  %v995_v47 = vand.u32 4294901760, %v994_v34 }
 0x278   :  { %1353 = vmatpush.msra.mxu1 %v1192_v53  ;;  %1324 = vmatpush.msra.mxu0 %v1227_v60  ;;  %v1241_v12 = vand.u32 4294901760, %v1240_v17  ;;  %v1426_v60 = vsub.f32 %v2010_v29, %v1425_v50 }
 0x279   :  { %1032 = vmatmul.f32.gmra.mxu1 %v993_v31  ;;  %1092 = vmatmul.f32.gmra.mxu3 %v995_v47  ;;  %v996_v48 = vsub.f32 %v994_v34, %v995_v47  ;;  %v1164_v34 = vor.u32 1.1754944e-38, %v1163_v11 }
 0x27a   :  { %1355 = vmatpush.msra.mxu1 %v1194_v32  ;;  %1328 = vmatpush.msra.mxu0 %v1233_v3 }
 0x27b   :  { %v997_v25 = vand.u32 4294901760, %v996_v48  ;;  %1265 = vmatpush.msra.mxu2 %v1226_v16  ;;  %1242 = vmatpush.msrb.mxu3 %v1241_v12  ;;  %v1160_v48 = vsel %vm1159_vm4, %v1645_v27, %v1156_v14  ;;  %v1431_v16 = vand.u32 4294901760, %v2014_v51 }
 0x27c   :  { %1357 = vmatpush.msra.mxu1 %v1196_v61  ;;  %1332 = vmatpush.msra.mxu0 %v1239_v6  ;;  %v1165_v52 = vsel %vm1162_vm6, %v1164_v34, %v1160_v48 }
 0x27d   :  { %998 = vmatmul.f32.gmra.mxu0 %v997_v25  ;;  %1268 = vmatpush.msra.mxu2 %v1232_v62  ;;  %v1419_v25 = vand.u32 4294901760, %v2001_v24  ;;  %v1432_v45 = vsub.f32 %v2014_v51, %v1431_v16 }
 0x27e   :  { %1291 = vmatpush.msra.mxu3 %v1190_v19 }
 0x27f   :  { %1271 = vmatpush.msra.mxu2 %v1238_v4  ;;  %v1420_v56 = vsub.f32 %v2001_v24, %v1419_v25  ;;  %v1427_v4 = vand.u32 4294901760, %v1426_v60 }
 0x280   :  { %1293 = vmatpush.msra.mxu3 %v1192_v53 }
 0x281   :  { %1144 = vmatmul.f32.vlgmr.msrb.gmra.mxu1 %v985_v36  ;;  %v1421_v1 = vand.u32 4294901760, %v1420_v56 }
 0x282   :  { %1483 = vmatpush.msrb.mxu1 %v1982_v28  ;;  %1295 = vmatpush.msra.mxu3 %v1194_v32  ;;  %v1368_v32 = vsel %vm335_vm5, %v1956_v2, 0  ;;  %v1433_v2 = vand.u32 4294901760, %v1432_v45 }
 0x283   :  { %v1390_v0 = vand.u32 4294901760, %v1368_v32 }
 0x284   :  { %1485 = vmatpush.msrb.mxu1 %v1991_v20  ;;  %1297 = vmatpush.msra.mxu3 %v1196_v61 }
 0x285   :  { %1118 = vmatmul.f32.vlgmr.msrb.gmra.mxu0 %v985_v36  ;;  %v1391_v9 = vsub.f32 %v1368_v32, %v1390_v0 }
 0x286   :  { %1454 = vmatpush.msrb.mxu0 %v1988_v18  ;;  %1487 = vmatpush.msrb.mxu1 %v2004_v26 }
 0x287   :  { %v1392_v8 = vand.u32 4294901760, %v1391_v9 }
 0x288   :  { %1457 = vmatpush.msrb.mxu0 %v2001_v24  ;;  %1489 = vmatpush.msrb.mxu1 %v2006_v54 }
 0x289   :  { %1148 = vmatmul.f32.gmra.mxu1 %v993_v31  ;;  %v1393_v17 = vsub.f32 %v1391_v9, %v1392_v8 }
 0x28a   :  { %1460 = vmatpush.msrb.mxu0 %v2010_v29 }
 0x28b   :  { %v1394_v10 = vand.u32 4294901760, %v1393_v17 }
 0x28c   :  { %1463 = vmatpush.msrb.mxu0 %v2014_v51 }
 0x28d   :  { %1122 = vmatmul.f32.gmra.mxu0 %v993_v31  ;;  %v1413_v31 = vand.u32 4294901760, %v1988_v18 }
 0x28f   :  { %v1414_v19 = vsub.f32 %v1988_v18, %v1413_v31 }
 0x291   :  { %v1415_v59 = vand.u32 4294901760, %v1414_v19 }
 0x2ee   :  { %v1029_v22 = vpop.f32.mrf.mxu1 }
 0x2f2   :  { %v991_v30 = vpop.f32.mrf.mxu0  ;;  %v1058_v33 = vpop.f32.mrf.mxu2 }
 0x2f3   :  { %v1030_v38 = vadd.f32 %v1029_v22, %v991_v30 }
 0x2f4   :  { %v1087_v7 = vpop.f32.mrf.mxu3 }
 0x2f5   :  { %v1059_v43 = vadd.f32 %v1058_v33, %v1030_v38 }
 0x2f6   :  { %v1033_v36 = vpop.f32.mrf.mxu1 }
 0x2f7   :  { %v1088_v23 = vadd.f32 %v1087_v7, %v1059_v43 }
 0x2fa   :  { %v999_v39 = vpop.f32.mrf.mxu0  ;;  %v1063_v40 = vpop.f32.mrf.mxu2 }
 0x2fc   :  { %v1093_v42 = vpop.f32.mrf.mxu3 }
 0x2fe   :  { %v1145_v44 = vpop.f32.mrf.mxu1 }
 0x302   :  { %v1119_v46 = vpop.f32.mrf.mxu0 }
 0x303   :  { %v1120_v47 = vadd.f32 %v1119_v46, %v1088_v23 }
 0x305   :  { %v1146_v49 = vadd.f32 %v1145_v44, %v1120_v47 }
 0x306   :  { %v1149_v53 = vpop.f32.mrf.mxu1 }
 0x307   :  { %v1166_v55 = vmul.f32 %v1165_v52, %v1146_v49 }
 0x309   :  { %v1176_v57 = vsel %vm335_vm5, %v1166_v55, 0 }
 0x30a   :  { %v1198_v62 = vand.u32 4294901760, %v1176_v57  ;;  %v1123_v61 = vpop.f32.mrf.mxu0 }
 0x30c   :  { %v1199_v3 = vsub.f32 %v1176_v57, %v1198_v62  ;;  %1244 = vmatmul.f32.vlgmr.msrb.gmra.mxu3 %v1198_v62  ;;  %1334 = vmatmul.f32.vlgmr.msra.gmra.mxu0 %v1198_v62 }
 0x30d   :  { %1359 = vmatmul.f32.vlgmr.msra.gmra.mxu1 %v1198_v62  ;;  %1416 = vmatpush.msrb.mxu3 %v1415_v59 }
 0x30e   :  { %v1200_v5 = vand.u32 4294901760, %v1199_v3 }
 0x30f   :  { %1422 = vmatpush.msrb.mxu3 %v1421_v1 }
 0x310   :  { %v1201_v58 = vsub.f32 %v1199_v3, %v1200_v5 }
 0x311   :  { %1428 = vmatpush.msrb.mxu3 %v1427_v4 }
 0x312   :  { %v1202_v6 = vand.u32 4294901760, %v1201_v58 }
 0x313   :  { %1434 = vmatpush.msrb.mxu3 %v1433_v2 }
 0x314   :  { %1203 = vmatmul.f32.vlgmr.msrb.gmra.mxu2 %v1202_v6  ;;  %1301 = vmatmul.f32.vlgmr.msra.gmra.mxu3 %v1200_v5 }
 0x315   :  { %1466 = vmatmul.f32.vlgmr.msrb.gmra.mxu0 %v1391_v9  ;;  %1493 = vmatmul.f32.vlgmr.msrb.gmra.mxu1 %v1392_v8 }
 0x316   :  { %1383 = vmatpush.msrb.mxu2 %v1982_v28  ;;  %1543 = vmatpush.msra.mxu3 %v1982_v28 }
 0x318   :  { %1385 = vmatpush.msrb.mxu2 %v1991_v20  ;;  %1545 = vmatpush.msra.mxu3 %v1991_v20 }
 0x31a   :  { %1387 = vmatpush.msrb.mxu2 %v2004_v26  ;;  %1547 = vmatpush.msra.mxu3 %v2004_v26 }
 0x31c   :  { %1274 = vmatmul.f32.vlgmr.msra.gmra.mxu2 %v1199_v3  ;;  %1436 = vmatmul.f32.vlgmr.msrb.gmra.mxu3 %v1390_v0 }
 0x31d   :  { %1389 = vmatpush.msrb.mxu2 %v2006_v54  ;;  %1549 = vmatpush.msra.mxu3 %v2006_v54 }
 0x31f   :  { %1512 = vmatpush.msra.mxu2 %v1413_v31 }
 0x321   :  { %1516 = vmatpush.msra.mxu2 %v1419_v25 }
 0x323   :  { %1520 = vmatpush.msra.mxu2 %v1425_v50 }
 0x324   :  { %1395 = vmatmul.f32.vlgmr.msrb.gmra.mxu2 %v1394_v10  ;;  %1551 = vmatmul.f32.vlgmr.msra.gmra.mxu3 %v1390_v0 }
 0x325   :  { %1524 = vmatpush.msra.mxu2 %v1431_v16 }
 0x32c   :  { %1526 = vmatmul.f32.vlgmr.msra.gmra.mxu2 %v1390_v0 }
 0x389   :  { %v1335_v20 = vpop.f32.mrf.mxu0 }
 0x38a   :  { %v1360_v22 = vpop.f32.mrf.mxu1 }
 0x38f   :  { %v1245_v12 = vpop.f32.mrf.mxu3 }
 0x392   :  { %v1467_v51 = vpop.f32.mrf.mxu0  ;;  %v1494_v35 = vpop.f32.mrf.mxu1 }
 0x397   :  { %v1204_v28 = vpop.f32.mrf.mxu2  ;;  %v1302_v18 = vpop.f32.mrf.mxu3 }
 0x398   :  { %v1205_v21 = vadd.f32 %v1635_v13, %v1204_v28 }
 0x39a   :  { %v1246_v24 = vadd.f32 %v1245_v12, %v1205_v21 }
 0x39f   :  { %v1275_v63 = vpop.f32.mrf.mxu2  ;;  %v1437_v54 = vpop.f32.mrf.mxu3 }
 0x3a0   :  { %v1276_v26 = vadd.f32 %v1275_v63, %v1246_v24 }
 0x3a2   :  { %v1303_v30 = vadd.f32 %v1302_v18, %v1276_v26 }
 0x3a4   :  { %v1336_v7 = vadd.f32 %v1335_v20, %v1303_v30 }
 0x3a6   :  { %v1361_v41 = vadd.f32 %v1360_v22, %v1336_v7 }
 0x3a7   :  { %v1396_v27 = vpop.f32.mrf.mxu2  ;;  %v1552_v39 = vpop.f32.mrf.mxu3 }
 0x3a8   :  { %v1438_v29 = vadd.f32 %v1437_v54, %v1396_v27 }
 0x3aa   :  { %v1468_v33 = vadd.f32 %v1467_v51, %v1438_v29 }
 0x3ac   :  { %v1495_v36 = vadd.f32 %v1494_v35, %v1468_v33 }
 0x3af   :  { %v1527_v37 = vpop.f32.mrf.mxu2 }
 0x3b0   :  { %v1528_v38 = vadd.f32 %v1527_v37, %v1495_v36 }
 0x3b2   :  { %v1553_v40 = vadd.f32 %v1552_v39, %v1528_v38 }
 0x3b4   :  { %v1555_v42 = vadd.f32 %v1553_v40, %v1361_v41 }
 0x3b6   :  { %v1556_v43 = vmul.f32 %v1555_v42, %v1555_v42 }
 0x3b8   :  { %v1557_v44 = vsel %vm335_vm5, %v1556_v43, 0.0 }
 0x3b9   :  { %1558 = vadd.xlane.f32.xlu1 %v1557_v44 }
 0x42c   :  { %v1559_v11 = vpop.xlane.xlu1 %1558 }
 0x42d   :  { %1646 = vrsqrt.f32 %v1559_v11  ;;  %vm1567_vm7 = vcmp.eq.f32.partialorder %v1559_v11, inf  ;;  %v1570_v48 = vand.u32 2147483648, %v1559_v11  ;;  %vm1569_vm8 = vcmp.eq.f32.partialorder %v1559_v11, 0.0 }
 0x433   :  { %v1647_v14 = vpop.eup %1646 }
 0x434   :  { %v1561_v15 = vmul.f32 %v1647_v14, %v1559_v11 }
 0x436   :  { %v1562_v23 = vmul.f32 %v1647_v14, %v1561_v15 }
 0x438   :  { %v1563_v31 = vmul.f32 0.5, %v1562_v23 }
 0x43a   :  { %v1564_v46 = vsub.f32 1.5, %v1563_v31 }
 0x43c   :  { %v1565_v34 = vmul.f32 %v1647_v14, %v1564_v46 }
 0x43e   :  { %v1566_v47 = vmul.f32 %v1565_v34, %v1559_v11 }
 0x440   :  { %v1568_v25 = vsel %vm1567_vm7, %v1559_v11, %v1566_v47 }
 0x441   :  { %v1571_v49 = vsel %vm1569_vm8, %v1570_v48, %v1568_v25 }
 0x442   :  { %v1572_v19 = vmax.f32 %v1571_v49, 1e-12 }
 0x444   :  { %1648 = vrcp.f32 %v1572_v19  ;;  %v1584_v55 = vand.u32 2147483648, %v1572_v19  ;;  %v1582_v16 = vand.u32 2147483647, %v1572_v19  ;;  %vm1578_vm10 = vweird.f32 %v1572_v19 }
 0x446   :  { %v1585_v57 = vor.u32 1.1754944e-38, %v1584_v55  ;;  %vm1583_vm12 = vcmp.eq.f32.partialorder %v1582_v16, 8.507059e+37 }
 0x44a   :  { %v1649_v50 = vpop.eup %1648 }
 0x44b   :  { %v1574_v52 = vmul.f32 %v1649_v50, %v1572_v19  ;;  %vm1579_vm9 = vweird.f32 %v1649_v50 }
 0x44c   :  { %vm1580_vm11 = vmor %vm1578_vm10, %vm1579_vm9 }
 0x44d   :  { %v1575_v53 = vsub.f32 1.0, %v1574_v52 }
 0x44f   :  { %v1576_v56 = vmul.f32 %v1649_v50, %v1575_v53 }
 0x451   :  { %v1577_v32 = vadd.f32 %v1649_v50, %v1576_v56 }
 0x453   :  { %v1581_v59 = vsel %vm1580_vm11, %v1649_v50, %v1577_v32 }
 0x454   :  { %v1586_v60 = vsel %vm1583_vm12, %v1585_v57, %v1581_v59 }
 0x455   :  { %v1587_v62 = vmul.f32 %v1586_v60, %v1555_v42 }
 0x457   :  { %1588 = vst.msk [vmem:[#allocation2] sm:$0xff] %vm335_vm5, %v1587_v62 }
 0x458   :  { %1599 = dma.vmem_to_hbm [thread:$0]  %s1595_s19, 128, %s1597_s22, [#allocation3]  }
 0x459   :  { %1674 = dma.done.wait [#allocation3], 128  }
 0x45a   :  { %1675 = vsyncadd [#allocation3], 4294967168 }
 0x45b   :  { %1604 = vsyncpa [#allocation3], 1 }

</bundles_post_ra>
